<compile_context>
chip_gen: v7x
topology: tpu7x:2x2x1
jax: 0.10.0
libtpu: 0.0.40
codegen_flags: <defaults>
</compile_context>

<pallas_src>
import jax
import jax.numpy as jnp
import numpy as np
from jax.experimental import pallas as pl
from jax.experimental.pallas import tpu as pltpu


def _round_up(x, m):
    return (x + m - 1) // m * m


# ----------------------------- Pallas kernels ------------------------------

def _make_kernel(residual_mode):
    """bf16 matmul (f32 acc) + bias + PReLU, optional fused residual add/sub."""

    def epilogue(p_ref, w_ref, b_ref, a_ref):
        acc = jnp.dot(p_ref[...], w_ref[...],
                      preferred_element_type=jnp.float32)
        acc = acc + b_ref[...]
        a = a_ref[0]                                   # PReLU slope from SMEM
        return jnp.where(acc >= 0, acc, a * acc)       # PReLU (f32 epilogue)

    if residual_mode is None:
        def kernel(p_ref, w_ref, b_ref, a_ref, o_ref):
            o_ref[...] = epilogue(p_ref, w_ref, b_ref, a_ref).astype(o_ref.dtype)
    elif residual_mode == "add":
        def kernel(p_ref, w_ref, b_ref, a_ref, r_ref, o_ref):
            o_ref[...] = (epilogue(p_ref, w_ref, b_ref, a_ref)
                          + r_ref[...]).astype(o_ref.dtype)
    elif residual_mode == "sub":
        def kernel(p_ref, w_ref, b_ref, a_ref, r_ref, o_ref):
            o_ref[...] = (epilogue(p_ref, w_ref, b_ref, a_ref)
                          - r_ref[...]).astype(o_ref.dtype)
    else:
        raise ValueError(residual_mode)
    return kernel


def matmul_bias_prelu(patches, w_mat, bias, prelu_a,
                      residual=None, residual_mode=None):
    """out = prelu(patches @ w_mat + bias) (+/- residual), tiled over M."""
    M, K = patches.shape
    N = w_mat.shape[1]

    # Lane-dense output: pad N to a multiple of 128 (avoids masked vst,
    # raises MXU column utilization). Padded columns are sliced off below.
    N_pad = _round_up(N, 128)
    # M tiling: multiple of 16 (bf16 sublane packing), tile <= 512 rows, and
    # aim for >= 2 grid steps so the pipeline / megacore has parallelism.
    TM = min(512, _round_up(pl.cdiv(M, 2), 16))
    M_pad = _round_up(M, TM)
    grid = (M_pad // TM,)

    # bf16 MXU inputs; accumulation and epilogue stay in f32.
    p = patches.astype(jnp.bfloat16)
    w = w_mat.astype(jnp.bfloat16)
    b = bias.astype(jnp.float32).reshape(1, N)
    if M_pad != M:
        p = jnp.pad(p, ((0, M_pad - M), (0, 0)))
    if N_pad != N:
        w = jnp.pad(w, ((0, 0), (0, N_pad - N)))
        b = jnp.pad(b, ((0, 0), (0, N_pad - N)))
    a = jnp.asarray(prelu_a, jnp.float32).reshape(1)

    in_specs = [
        pl.BlockSpec((TM, K), lambda i: (i, 0)),            # patch tile
        pl.BlockSpec((K, N_pad), lambda i: (0, 0)),          # full weight
        pl.BlockSpec((1, N_pad), lambda i: (0, 0)),          # bias row
        pl.BlockSpec(memory_space=pltpu.MemorySpace.SMEM),   # PReLU slope
    ]
    args = [p, w, b, a]
    if residual is not None:
        r = residual.astype(jnp.float32)
        if N_pad != N:
            r = jnp.pad(r, ((0, 0), (0, N_pad - N)))
        if M_pad != M:
            r = jnp.pad(r, ((0, M_pad - M), (0, 0)))
        in_specs.append(pl.BlockSpec((TM, N_pad), lambda i: (i, 0)))
        args.append(r)

    out = pl.pallas_call(
        _make_kernel(residual_mode if residual is not None else None),
        out_shape=jax.ShapeDtypeStruct((M_pad, N_pad), jnp.float32),
        grid_spec=pltpu.PrefetchScalarGridSpec(
            num_scalar_prefetch=0,
            grid=grid,
            in_specs=in_specs,
            out_specs=pl.BlockSpec((TM, N_pad), lambda i: (i, 0)),
        ),
        compiler_params=pltpu.CompilerParams(
            dimension_semantics=("parallel",),
            vmem_limit_bytes=48 * 1024 * 1024,   # fits v7x 64 MiB VMEM
        ),
    )(*args)

    if M_pad != M or N_pad != N:
        out = out[:M, :N]
    return out


# ------------------------------- JAX glue ----------------------------------
# TODO(synk): fuse im2col patch formation into the Pallas kernel (BlockSpec
# over NHWC rows / manual DMA) to remove the materialized patch matrices.

def im2col_nhwc(x, k, stride, pad_before, pad_after=None):
    """x: (B,H,W,C) -> patches (B*Ho*Wo, k*k*C), columns ordered (kh, kw, C)."""
    if pad_after is None:
        pad_after = pad_before
    B, H, W, C = x.shape
    xp = jnp.pad(x, ((0, 0), (pad_before, pad_after),
                     (pad_before, pad_after), (0, 0)))
    Ho = (H + pad_before + pad_after - k) // stride + 1
    Wo = (W + pad_before + pad_after - k) // stride + 1
    ii = (jnp.arange(Ho) * stride)[:, None] + jnp.arange(k)[None, :]   # (Ho,k)
    jj = (jnp.arange(Wo) * stride)[:, None] + jnp.arange(k)[None, :]   # (Wo,k)
    p = xp[:, ii[:, :, None, None], jj[None, None, :, :], :]          # (B,Ho,k,Wo,k,C)
    p = p.transpose(0, 1, 3, 2, 4, 5).reshape(B * Ho * Wo, k * k * C)
    return p, Ho, Wo


def conv_w_to_mat(w_oihw):
    """Conv2d weight (O, I, kh, kw) -> (kh*kw*I, O), matching im2col order."""
    O, I, kh, kw = w_oihw.shape
    return w_oihw.transpose(2, 3, 1, 0).reshape(kh * kw * I, O)


def deconv_phase_weight(w_iohw, k, s, p):
    """ConvTranspose2d(k, s, p) as ONE matmul over s*s output phases.

    For a TxT stride-1 window over the zero-padded low-res input,
    patches @ Wmat gives the deconv output in phase layout, with N ordered
    (ry, rx, o).  Derived directly from the ConvTranspose2d formula
    ky = s*(q - yi) + ry + p; taps with ky outside [0, k) are zero-masked.
    Returns (Wmat[(ty,tx,i),(ry,rx,o)], T, pad_before, pad_after).
    """
    I, O, kh, kw = w_iohw.shape
    assert kh == k and kw == k and k == s + 2 * p, "expects k = s + 2*p"
    D = sorted({d for d in range(-(k // s) - 1, (k // s) + 2)
                for r in range(s) if 0 <= s * d + r + p < k})
    dmin, dmax = D[0], D[-1]
    T = dmax - dmin + 1                                   # window size (3 for 8/4/2)
    ky = s * (dmax - np.arange(T))[:, None] + np.arange(s)[None, :] + p   # (T, s)
    valid = (ky >= 0) & (ky < k)
    ky_i = jnp.asarray(np.clip(ky, 0, k - 1))
    mask = jnp.asarray(valid.astype(np.float32))
    g = w_iohw[:, :, ky_i[:, :, None, None], ky_i[None, None, :, :]]     # (I,O,T,s,T,s)
    g = g * (mask[:, :, None, None] * mask[None, None, :, :])[None, None]
    wmat = g.transpose(2, 4, 0, 3, 5, 1).reshape(T * T * I, s * s * O)
    return wmat, T, dmax, -dmin


def phase_to_nhwc(yp, B, H, W, s, C):
    """(B*H*W, s*s*C) phase layout (ry, rx, c) -> (B, s*H, s*W, C)."""
    y = yp.reshape(B, H, W, s, s, C).transpose(0, 1, 3, 2, 4, 5)
    return y.reshape(B, H * s, W * s, C)


# ------------------------------ D_UpBlock -----------------------------------

def init_params(key, num_filter, num_stages, kernel_size):
    ks = jax.random.split(key, 8)

    def w(k_, shape):
        return jax.random.normal(k_, shape, jnp.float32) * 0.05

    C = num_filter
    return {
        # ConvBlock(num_filter*num_stages -> num_filter, 1x1)   (Conv2d: OIHW)
        "w_conv": w(ks[0], (C, C * num_stages, 1, 1)),
        "b_conv": w(ks[1], (C,)),
        # DeconvBlock up_conv1                                   (ConvT: IOHW)
        "w_up1": w(ks[2], (C, C, kernel_size, kernel_size)),
        "b_up1": w(ks[3], (C,)),
        # ConvBlock up_conv2                                     (Conv2d: OIHW)
        "w_up2": w(ks[4], (C, C, kernel_size, kernel_size)),
        "b_up2": w(ks[5], (C,)),
        # DeconvBlock up_conv3                                   (ConvT: IOHW)
        "w_up3": w(ks[6], (C, C, kernel_size, kernel_size)),
        "b_up3": w(ks[7], (C,)),
        # PReLU slopes (PyTorch default init = 0.25, one per block)
        "a_conv": jnp.float32(0.25), "a_up1": jnp.float32(0.25),
        "a_up2": jnp.float32(0.25), "a_up3": jnp.float32(0.25),
    }


def d_up_block_forward(x_nchw, params, kernel_size=8, stride=4, padding=2):
    B, Cin, H, W = x_nchw.shape
    k, s, pd = kernel_size, stride, padding
    C = params["b_conv"].shape[0]
    x = jnp.transpose(x_nchw, (0, 2, 3, 1))                         # -> NHWC

    # conv: 1x1 conv + PReLU -> xf   (rows = B*H*W, NHWC row-major)
    w1 = conv_w_to_mat(params["w_conv"])
    xf = matmul_bias_prelu(x.reshape(B * H * W, Cin), w1,
                           params["b_conv"], params["a_conv"])      # (BHW, C)

    # up_conv1: ConvTranspose2d(k,s,pd) + PReLU via sub-pixel phase matmul -> h0
    w2, T, pb, pa = deconv_phase_weight(params["w_up1"], k, s, pd)
    p2, _, _ = im2col_nhwc(xf.reshape(B, H, W, C), T, 1, pb, pa)
    h0p = matmul_bias_prelu(p2, w2, jnp.tile(params["b_up1"], s * s),
                            params["a_up1"])                        # (BHW, s*s*C)
    h0 = phase_to_nhwc(h0p, B, H, W, s, C)                          # (B,4H,4W,C)

    # up_conv2: Conv2d(k,s,pd) + PReLU, fused "- x" residual -> l0 - x
    w3 = conv_w_to_mat(params["w_up2"])
    p3, Hl, Wl = im2col_nhwc(h0, k, s, pd)
    d = matmul_bias_prelu(p3, w3, params["b_up2"], params["a_up2"],
                          residual=xf, residual_mode="sub")         # (BHW, C)

    # up_conv3: ConvTranspose2d(k,s,pd) + PReLU, fused "+ h0" (phase layout)
    w4, _, _, _ = deconv_phase_weight(params["w_up3"], k, s, pd)
    p4, _, _ = im2col_nhwc(d.reshape(B, Hl, Wl, C), T, 1, pb, pa)
    outp = matmul_bias_prelu(p4, w4, jnp.tile(params["b_up3"], s * s),
                             params["a_up3"],
                             residual=h0p, residual_mode="add")     # (BHW, s*s*C)
    out = phase_to_nhwc(outp, B, Hl, Wl, s, C)
    return out.transpose(0, 3, 1, 2)                                # -> NCHW


# ------------------------- pure-JAX reference check -------------------------

def _prelu(x, a):
    return jnp.where(x >= 0, x, a * x)


def _ref_conv(x, w_oihw, b, stride, pad):
    y = jax.lax.conv_general_dilated(
        x, w_oihw, window_strides=(stride, stride),
        padding=[(pad, pad), (pad, pad)],
        dimension_numbers=("NCHW", "OIHW", "NCHW"))
    return y + b[None, :, None, None]


def _ref_deconv(x, w_iohw, b, stride, pad, k):
    w_conv = jnp.flip(w_iohw, axis=(2, 3)).transpose(1, 0, 2, 3)    # -> OIHW
    y = jax.lax.conv_general_dilated(
        x, w_conv, window_strides=(1, 1),
        padding=[(k - 1 - pad, k - 1 - pad)] * 2,
        lhs_dilation=(stride, stride),
        dimension_numbers=("NCHW", "OIHW", "NCHW"))
    return y + b[None, :, None, None]


def ref_forward(x, p, k=8, s=4, pd=2):
    x1 = _prelu(_ref_conv(x, p["w_conv"], p["b_conv"], 1, 0), p["a_conv"])
    h0 = _prelu(_ref_deconv(x1, p["w_up1"], p["b_up1"], s, pd, k), p["a_up1"])
    l0 = _prelu(_ref_conv(h0, p["w_up2"], p["b_up2"], s, pd), p["a_up2"])
    h1 = _prelu(_ref_deconv(l0 - x1, p["w_up3"], p["b_up3"], s, pd, k), p["a_up3"])
    return h1 + h0


# ---------------------------------- main ------------------------------------

if __name__ == "__main__":
    num_filter, num_stages = 4, 1
    B, H, W = 2, 8, 8
    key = jax.random.PRNGKey(0)
    kx, kp = jax.random.split(key)

    x = jax.random.normal(kx, (B, num_filter * num_stages, H, W), jnp.float32)
    params = init_params(kp, num_filter, num_stages, kernel_size=8)

    fwd = jax.jit(d_up_block_forward)
    out = jax.block_until_ready(fwd(x, params))
    assert out.shape == (B, num_filter, 4 * H, 4 * W), out.shape

    ref = jax.block_until_ready(ref_forward(x, params))
    # bf16 MXU inputs (f32 accumulation) -> small relative error vs f32 ref.
    np.testing.assert_allclose(np.asarray(out), np.asarray(ref),
                               rtol=2e-2, atol=2e-2)
    print("KERNEL_OK")
</pallas_src>

<mosaic_0001>
module attributes {stable_mosaic.version = 11 : i64} {
  func.func @kernel(%arg0: i32, %arg1: memref<64x4xbf16, #tpu.memory_space<vmem>>, %arg2: memref<4x128xbf16, #tpu.memory_space<vmem>>, %arg3: memref<1x128xf32, #tpu.memory_space<vmem>>, %arg4: memref<1xf32, #tpu.memory_space<smem>>, %arg5: memref<64x128xf32, #tpu.memory_space<vmem>>) attributes {dimension_semantics = [#tpu.dimension_semantics<parallel>], iteration_bounds = array<i64: 2>, scalar_prefetch = 0 : i64, scratch_operands = 0 : i64, tpu.core_type = #tpu.core_type<tc>, window_params = [{transform_indices = @transform_0, window_bounds = array<i64: 64, 4>}, {pipeline_mode = #tpu.pipeline_mode<synchronous>, transform_indices = @transform_1, window_bounds = array<i64: 4, 128>}, {pipeline_mode = #tpu.pipeline_mode<synchronous>, transform_indices = @transform_2, window_bounds = array<i64: 1, 128>}, {transform_indices = @transform_3, window_bounds = array<i64: 1>}, {transform_indices = @transform_4, window_bounds = array<i64: 64, 128>}]} {
    %c0 = arith.constant 0 : index
    %c0_0 = arith.constant 0 : index
    %0 = vector.load %arg1[%c0, %c0_0] : memref<64x4xbf16, #tpu.memory_space<vmem>>, vector<64x4xbf16>
    %c0_1 = arith.constant 0 : index
    %c0_2 = arith.constant 0 : index
    %1 = vector.load %arg2[%c0_1, %c0_2] : memref<4x128xbf16, #tpu.memory_space<vmem>>, vector<4x128xbf16>
    %cst = arith.constant dense<0.000000e+00> : vector<64x128xf32>
    %2 = tpu.matmul %0, %1, %cst {dimension_numbers = #tpu.dot_dimension_numbers<[1], [0], [0], [1], [0, 0, 1, 1], [], []>} : vector<64x4xbf16>, vector<4x128xbf16>, vector<64x128xf32> -> vector<64x128xf32>
    %c0_3 = arith.constant 0 : index
    %c0_4 = arith.constant 0 : index
    %3 = vector.load %arg3[%c0_3, %c0_4] : memref<1x128xf32, #tpu.memory_space<vmem>>, vector<1x128xf32>
    %4 = vector.broadcast %3 : vector<1x128xf32> to vector<64x128xf32>
    %5 = arith.addf %2, %4 : vector<64x128xf32>
    %c0_5 = arith.constant 0 : index
    %6 = memref.load %arg4[%c0_5] : memref<1xf32, #tpu.memory_space<smem>>
    %cst_6 = arith.constant 0.000000e+00 : f32
    %7 = vector.broadcast %cst_6 : f32 to vector<64x128xf32>
    %8 = arith.cmpf oge, %5, %7 : vector<64x128xf32>
    %9 = vector.broadcast %6 : f32 to vector<64x128xf32>
    %10 = arith.mulf %9, %5 : vector<64x128xf32>
    %11 = arith.select %8, %5, %10 : vector<64x128xi1>, vector<64x128xf32>
    %c0_7 = arith.constant 0 : index
    %c0_8 = arith.constant 0 : index
    %12 = vector.load %arg5[%c0_7, %c0_8] : memref<64x128xf32, #tpu.memory_space<vmem>>, vector<64x128xf32>
    tpu.vector_store %arg5[%c0_7, %c0_8], %11 {strides = array<i32>} : memref<64x128xf32, #tpu.memory_space<vmem>>, vector<64x128xf32>,
    return
  }
  func.func @transform_0(%arg0: i32) -> (i32, i32) {
    %c0_i32 = arith.constant 0 : i32
    %c0_i32_0 = arith.constant 0 : i32
    return %arg0, %c0_i32 : i32, i32
  }
  func.func @transform_1(%arg0: i32) -> (i32, i32) {
    %c0_i32 = arith.constant 0 : i32
    %c0_i32_0 = arith.constant 0 : i32
    %c0_i32_1 = arith.constant 0 : i32
    return %c0_i32, %c0_i32_0 : i32, i32
  }
  func.func @transform_2(%arg0: i32) -> (i32, i32) {
    %c0_i32 = arith.constant 0 : i32
    %c0_i32_0 = arith.constant 0 : i32
    %c0_i32_1 = arith.constant 0 : i32
    return %c0_i32, %c0_i32_0 : i32, i32
  }
  func.func @transform_3(%arg0: i32) -> i32 {
    %c0_i32 = arith.constant 0 : i32
    %c0_i32_0 = arith.constant 0 : i32
    return %c0_i32 : i32
  }
  func.func @transform_4(%arg0: i32) -> (i32, i32) {
    %c0_i32 = arith.constant 0 : i32
    %c0_i32_0 = arith.constant 0 : i32
    return %arg0, %c0_i32 : i32, i32
  }
}

module attributes {stable_mosaic.version = 11 : i64} {
  func.func @kernel(%arg0: i32, %arg1: memref<64x36xbf16, #tpu.memory_space<vmem>>, %arg2: memref<36x128xbf16, #tpu.memory_space<vmem>>, %arg3: memref<1x128xf32, #tpu.memory_space<vmem>>, %arg4: memref<1xf32, #tpu.memory_space<smem>>, %arg5: memref<64x128xf32, #tpu.memory_space<vmem>>) attributes {dimension_semantics = [#tpu.dimension_semantics<parallel>], iteration_bounds = array<i64: 2>, scalar_prefetch = 0 : i64, scratch_operands = 0 : i64, tpu.core_type = #tpu.core_type<tc>, window_params = [{transform_indices = @transform_0, window_bounds = array<i64: 64, 36>}, {pipeline_mode = #tpu.pipeline_mode<synchronous>, transform_indices = @transform_1, window_bounds = array<i64: 36, 128>}, {pipeline_mode = #tpu.pipeline_mode<synchronous>, transform_indices = @transform_2, window_bounds = array<i64: 1, 128>}, {transform_indices = @transform_3, window_bounds = array<i64: 1>}, {transform_indices = @transform_4, window_bounds = array<i64: 64, 128>}]} {
    %c0 = arith.constant 0 : index
    %c0_0 = arith.constant 0 : index
    %0 = vector.load %arg1[%c0, %c0_0] : memref<64x36xbf16, #tpu.memory_space<vmem>>, vector<64x36xbf16>
    %c0_1 = arith.constant 0 : index
    %c0_2 = arith.constant 0 : index
    %1 = vector.load %arg2[%c0_1, %c0_2] : memref<36x128xbf16, #tpu.memory_space<vmem>>, vector<36x128xbf16>
    %cst = arith.constant dense<0.000000e+00> : vector<64x128xf32>
    %2 = tpu.matmul %0, %1, %cst {dimension_numbers = #tpu.dot_dimension_numbers<[1], [0], [0], [1], [0, 0, 1, 1], [], []>} : vector<64x36xbf16>, vector<36x128xbf16>, vector<64x128xf32> -> vector<64x128xf32>
    %c0_3 = arith.constant 0 : index
    %c0_4 = arith.constant 0 : index
    %3 = vector.load %arg3[%c0_3, %c0_4] : memref<1x128xf32, #tpu.memory_space<vmem>>, vector<1x128xf32>
    %4 = vector.broadcast %3 : vector<1x128xf32> to vector<64x128xf32>
    %5 = arith.addf %2, %4 : vector<64x128xf32>
    %c0_5 = arith.constant 0 : index
    %6 = memref.load %arg4[%c0_5] : memref<1xf32, #tpu.memory_space<smem>>
    %cst_6 = arith.constant 0.000000e+00 : f32
    %7 = vector.broadcast %cst_6 : f32 to vector<64x128xf32>
    %8 = arith.cmpf oge, %5, %7 : vector<64x128xf32>
    %9 = vector.broadcast %6 : f32 to vector<64x128xf32>
    %10 = arith.mulf %9, %5 : vector<64x128xf32>
    %11 = arith.select %8, %5, %10 : vector<64x128xi1>, vector<64x128xf32>
    %c0_7 = arith.constant 0 : index
    %c0_8 = arith.constant 0 : index
    %12 = vector.load %arg5[%c0_7, %c0_8] : memref<64x128xf32, #tpu.memory_space<vmem>>, vector<64x128xf32>
    tpu.vector_store %arg5[%c0_7, %c0_8], %11 {strides = array<i32>} : memref<64x128xf32, #tpu.memory_space<vmem>>, vector<64x128xf32>,
    return
  }
  func.func @transform_0(%arg0: i32) -> (i32, i32) {
    %c0_i32 = arith.constant 0 : i32
    %c0_i32_0 = arith.constant 0 : i32
    return %arg0, %c0_i32 : i32, i32
  }
  func.func @transform_1(%arg0: i32) -> (i32, i32) {
    %c0_i32 = arith.constant 0 : i32
    %c0_i32_0 = arith.constant 0 : i32
    %c0_i32_1 = arith.constant 0 : i32
    return %c0_i32, %c0_i32_0 : i32, i32
  }
  func.func @transform_2(%arg0: i32) -> (i32, i32) {
    %c0_i32 = arith.constant 0 : i32
    %c0_i32_0 = arith.constant 0 : i32
    %c0_i32_1 = arith.constant 0 : i32
    return %c0_i32, %c0_i32_0 : i32, i32
  }
  func.func @transform_3(%arg0: i32) -> i32 {
    %c0_i32 = arith.constant 0 : i32
    %c0_i32_0 = arith.constant 0 : i32
    return %c0_i32 : i32
  }
  func.func @transform_4(%arg0: i32) -> (i32, i32) {
    %c0_i32 = arith.constant 0 : i32
    %c0_i32_0 = arith.constant 0 : i32
    return %arg0, %c0_i32 : i32, i32
  }
}

module attributes {stable_mosaic.version = 11 : i64} {
  func.func @kernel(%arg0: i32, %arg1: memref<64x256xbf16, #tpu.memory_space<vmem>>, %arg2: memref<256x128xbf16, #tpu.memory_space<vmem>>, %arg3: memref<1x128xf32, #tpu.memory_space<vmem>>, %arg4: memref<1xf32, #tpu.memory_space<smem>>, %arg5: memref<64x128xf32, #tpu.memory_space<vmem>>, %arg6: memref<64x128xf32, #tpu.memory_space<vmem>>) attributes {dimension_semantics = [#tpu.dimension_semantics<parallel>], iteration_bounds = array<i64: 2>, scalar_prefetch = 0 : i64, scratch_operands = 0 : i64, tpu.core_type = #tpu.core_type<tc>, window_params = [{transform_indices = @transform_0, window_bounds = array<i64: 64, 256>}, {pipeline_mode = #tpu.pipeline_mode<synchronous>, transform_indices = @transform_1, window_bounds = array<i64: 256, 128>}, {pipeline_mode = #tpu.pipeline_mode<synchronous>, transform_indices = @transform_2, window_bounds = array<i64: 1, 128>}, {transform_indices = @transform_3, window_bounds = array<i64: 1>}, {transform_indices = @transform_4, window_bounds = array<i64: 64, 128>}, {transform_indices = @transform_5, window_bounds = array<i64: 64, 128>}]} {
    %c0 = arith.constant 0 : index
    %c0_0 = arith.constant 0 : index
    %0 = vector.load %arg1[%c0, %c0_0] : memref<64x256xbf16, #tpu.memory_space<vmem>>, vector<64x256xbf16>
    %c0_1 = arith.constant 0 : index
    %c0_2 = arith.constant 0 : index
    %1 = vector.load %arg2[%c0_1, %c0_2] : memref<256x128xbf16, #tpu.memory_space<vmem>>, vector<256x128xbf16>
    %cst = arith.constant dense<0.000000e+00> : vector<64x128xf32>
    %2 = tpu.matmul %0, %1, %cst {dimension_numbers = #tpu.dot_dimension_numbers<[1], [0], [0], [1], [0, 0, 1, 1], [], []>} : vector<64x256xbf16>, vector<256x128xbf16>, vector<64x128xf32> -> vector<64x128xf32>
    %c0_3 = arith.constant 0 : index
    %c0_4 = arith.constant 0 : index
    %3 = vector.load %arg3[%c0_3, %c0_4] : memref<1x128xf32, #tpu.memory_space<vmem>>, vector<1x128xf32>
    %4 = vector.broadcast %3 : vector<1x128xf32> to vector<64x128xf32>
    %5 = arith.addf %2, %4 : vector<64x128xf32>
    %c0_5 = arith.constant 0 : index
    %6 = memref.load %arg4[%c0_5] : memref<1xf32, #tpu.memory_space<smem>>
    %cst_6 = arith.constant 0.000000e+00 : f32
    %7 = vector.broadcast %cst_6 : f32 to vector<64x128xf32>
    %8 = arith.cmpf oge, %5, %7 : vector<64x128xf32>
    %9 = vector.broadcast %6 : f32 to vector<64x128xf32>
    %10 = arith.mulf %9, %5 : vector<64x128xf32>
    %11 = arith.select %8, %5, %10 : vector<64x128xi1>, vector<64x128xf32>
    %c0_7 = arith.constant 0 : index
    %c0_8 = arith.constant 0 : index
    %12 = vector.load %arg5[%c0_7, %c0_8] : memref<64x128xf32, #tpu.memory_space<vmem>>, vector<64x128xf32>
    %13 = arith.subf %11, %12 : vector<64x128xf32>
    %c0_9 = arith.constant 0 : index
    %c0_10 = arith.constant 0 : index
    %14 = vector.load %arg6[%c0_9, %c0_10] : memref<64x128xf32, #tpu.memory_space<vmem>>, vector<64x128xf32>
    tpu.vector_store %arg6[%c0_9, %c0_10], %13 {strides = array<i32>} : memref<64x128xf32, #tpu.memory_space<vmem>>, vector<64x128xf32>,
    return
  }
  func.func @transform_0(%arg0: i32) -> (i32, i32) {
    %c0_i32 = arith.constant 0 : i32
    %c0_i32_0 = arith.constant 0 : i32
    return %arg0, %c0_i32 : i32, i32
  }
  func.func @transform_1(%arg0: i32) -> (i32, i32) {
    %c0_i32 = arith.constant 0 : i32
    %c0_i32_0 = arith.constant 0 : i32
    %c0_i32_1 = arith.constant 0 : i32
    return %c0_i32, %c0_i32_0 : i32, i32
  }
  func.func @transform_2(%arg0: i32) -> (i32, i32) {
    %c0_i32 = arith.constant 0 : i32
    %c0_i32_0 = arith.constant 0 : i32
    %c0_i32_1 = arith.constant 0 : i32
    return %c0_i32, %c0_i32_0 : i32, i32
  }
  func.func @transform_3(%arg0: i32) -> i32 {
    %c0_i32 = arith.constant 0 : i32
    %c0_i32_0 = arith.constant 0 : i32
    return %c0_i32 : i32
  }
  func.func @transform_4(%arg0: i32) -> (i32, i32) {
    %c0_i32 = arith.constant 0 : i32
    %c0_i32_0 = arith.constant 0 : i32
    return %arg0, %c0_i32 : i32, i32
  }
  func.func @transform_5(%arg0: i32) -> (i32, i32) {
    %c0_i32 = arith.constant 0 : i32
    %c0_i32_0 = arith.constant 0 : i32
    return %arg0, %c0_i32 : i32, i32
  }
}

module attributes {stable_mosaic.version = 11 : i64} {
  func.func @kernel(%arg0: i32, %arg1: memref<64x36xbf16, #tpu.memory_space<vmem>>, %arg2: memref<36x128xbf16, #tpu.memory_space<vmem>>, %arg3: memref<1x128xf32, #tpu.memory_space<vmem>>, %arg4: memref<1xf32, #tpu.memory_space<smem>>, %arg5: memref<64x128xf32, #tpu.memory_space<vmem>>, %arg6: memref<64x128xf32, #tpu.memory_space<vmem>>) attributes {dimension_semantics = [#tpu.dimension_semantics<parallel>], iteration_bounds = array<i64: 2>, scalar_prefetch = 0 : i64, scratch_operands = 0 : i64, tpu.core_type = #tpu.core_type<tc>, window_params = [{transform_indices = @transform_0, window_bounds = array<i64: 64, 36>}, {pipeline_mode = #tpu.pipeline_mode<synchronous>, transform_indices = @transform_1, window_bounds = array<i64: 36, 128>}, {pipeline_mode = #tpu.pipeline_mode<synchronous>, transform_indices = @transform_2, window_bounds = array<i64: 1, 128>}, {transform_indices = @transform_3, window_bounds = array<i64: 1>}, {transform_indices = @transform_4, window_bounds = array<i64: 64, 128>}, {transform_indices = @transform_5, window_bounds = array<i64: 64, 128>}]} {
    %c0 = arith.constant 0 : index
    %c0_0 = arith.constant 0 : index
    %0 = vector.load %arg1[%c0, %c0_0] : memref<64x36xbf16, #tpu.memory_space<vmem>>, vector<64x36xbf16>
    %c0_1 = arith.constant 0 : index
    %c0_2 = arith.constant 0 : index
    %1 = vector.load %arg2[%c0_1, %c0_2] : memref<36x128xbf16, #tpu.memory_space<vmem>>, vector<36x128xbf16>
    %cst = arith.constant dense<0.000000e+00> : vector<64x128xf32>
    %2 = tpu.matmul %0, %1, %cst {dimension_numbers = #tpu.dot_dimension_numbers<[1], [0], [0], [1], [0, 0, 1, 1], [], []>} : vector<64x36xbf16>, vector<36x128xbf16>, vector<64x128xf32> -> vector<64x128xf32>
    %c0_3 = arith.constant 0 : index
    %c0_4 = arith.constant 0 : index
    %3 = vector.load %arg3[%c0_3, %c0_4] : memref<1x128xf32, #tpu.memory_space<vmem>>, vector<1x128xf32>
    %4 = vector.broadcast %3 : vector<1x128xf32> to vector<64x128xf32>
    %5 = arith.addf %2, %4 : vector<64x128xf32>
    %c0_5 = arith.constant 0 : index
    %6 = memref.load %arg4[%c0_5] : memref<1xf32, #tpu.memory_space<smem>>
    %cst_6 = arith.constant 0.000000e+00 : f32
    %7 = vector.broadcast %cst_6 : f32 to vector<64x128xf32>
    %8 = arith.cmpf oge, %5, %7 : vector<64x128xf32>
    %9 = vector.broadcast %6 : f32 to vector<64x128xf32>
    %10 = arith.mulf %9, %5 : vector<64x128xf32>
    %11 = arith.select %8, %5, %10 : vector<64x128xi1>, vector<64x128xf32>
    %c0_7 = arith.constant 0 : index
    %c0_8 = arith.constant 0 : index
    %12 = vector.load %arg5[%c0_7, %c0_8] : memref<64x128xf32, #tpu.memory_space<vmem>>, vector<64x128xf32>
    %13 = arith.addf %11, %12 : vector<64x128xf32>
    %c0_9 = arith.constant 0 : index
    %c0_10 = arith.constant 0 : index
    %14 = vector.load %arg6[%c0_9, %c0_10] : memref<64x128xf32, #tpu.memory_space<vmem>>, vector<64x128xf32>
    tpu.vector_store %arg6[%c0_9, %c0_10], %13 {strides = array<i32>} : memref<64x128xf32, #tpu.memory_space<vmem>>, vector<64x128xf32>,
    return
  }
  func.func @transform_0(%arg0: i32) -> (i32, i32) {
    %c0_i32 = arith.constant 0 : i32
    %c0_i32_0 = arith.constant 0 : i32
    return %arg0, %c0_i32 : i32, i32
  }
  func.func @transform_1(%arg0: i32) -> (i32, i32) {
    %c0_i32 = arith.constant 0 : i32
    %c0_i32_0 = arith.constant 0 : i32
    %c0_i32_1 = arith.constant 0 : i32
    return %c0_i32, %c0_i32_0 : i32, i32
  }
  func.func @transform_2(%arg0: i32) -> (i32, i32) {
    %c0_i32 = arith.constant 0 : i32
    %c0_i32_0 = arith.constant 0 : i32
    %c0_i32_1 = arith.constant 0 : i32
    return %c0_i32, %c0_i32_0 : i32, i32
  }
  func.func @transform_3(%arg0: i32) -> i32 {
    %c0_i32 = arith.constant 0 : i32
    %c0_i32_0 = arith.constant 0 : i32
    return %c0_i32 : i32
  }
  func.func @transform_4(%arg0: i32) -> (i32, i32) {
    %c0_i32 = arith.constant 0 : i32
    %c0_i32_0 = arith.constant 0 : i32
    return %arg0, %c0_i32 : i32, i32
  }
  func.func @transform_5(%arg0: i32) -> (i32, i32) {
    %c0_i32 = arith.constant 0 : i32
    %c0_i32_0 = arith.constant 0 : i32
    return %arg0, %c0_i32 : i32, i32
  }
}

</mosaic_0001>

<bundles_post_ra>
// kernel: tile.13
= control target key start
LH: loop header
LB: loop body
LE: loop exit
PB: predicated region body
PF: predicated region fallthrough
CT: control target
= control target key end

     0   :  { %2 = vsyncpa [#allocation1], 0  ;;  %s47_s6 = smov [#allocation0]   ;;  %s76_s0 = inlined_call_operand.hbm [shape: f32[4], index: 0, kind: input, shape index: {}]   ;;  %s77_s1 = inlined_call_operand.vmem [shape: f32[16,4], index: 1, kind: output, shape index: {}]  }
   0x1   :  { %s9_s7 = sshll.u32 %s47_s6, 4  ;;  %s23_s10 = scalar_lea.hbm %s76_s0, 16  ;;  %s10_s7 = int_to_ptr.vmem [resolvable:$true] %s9_s7 }
   0x2   :  { %p24_p0 = scmp.ne.s32.totalorder %s76_s0, %s23_s10  ;;  %p27_p1 = scmp.lt.u32.totalorder %s23_s10, %s76_s0 }
   0x4   :  { %p29_p2 = pnand %p27_p1, %p24_p0 }
   0x6   :  { %32 = shalt.err (!%p29_p2)
}
   0x7   :  { %s33_s15 = scalar_lea.vmem %s10_s7, 16  ;;  %s37_s16 = scalar_lea.vmem %s10_s7, 32 }
   0x8   :  { %p34_p3 = scmp.ne.s32.totalorder %s10_s7, %s33_s15  ;;  %p38_p4 = scmp.lt.s32.totalorder %s10_s7, %s10_s7 }
   0x9   :  { %p39_p5 = scmp.lt.s32.totalorder %s37_s16, %s33_s15 }
   0xb   :  { %p40_p6 = por %p39_p5, %p38_p4 }
   0xd   :  { %p41_p7 = pnand %p40_p6, %p34_p3 }
   0xf   :  { %44 = shalt.err (!%p41_p7)
}
  0x10   :  { %12 = dma.hbm_to_vmem [thread:$0]  %s76_s0, 16, %s10_s7, [#allocation1]  }
  0x11   :  { %45 = dma.done.wait [#allocation1], 16  }
  0x12   :  { %46 = vsyncadd [#allocation1], 4294967280  ;;  %v16_v0 = vld [vmem:[#allocation0] ss:$0 sm:$0xff] }
  0x13   :  { %17 = vst [vmem:[%s77_s1] sm:$0xff] %v16_v0  ;;  %21 = vst [vmem:[%s77_s1 + $0x8] sm:$0xff] %v16_v0 }
  0x14   :  { %20 = vsyncpa [#allocation1], 1 }

// kernel: tile.14
= control target key start
LH: loop header
LB: loop body
LE: loop exit
PB: predicated region body
PF: predicated region fallthrough
CT: control target
= control target key end

     0   :  { %s131_s10 = smov 60   ;;  %s132_s11 = smov 52   ;;  %vm3_vm0 = vcmask 31744   ;;  %vm9_vm1 = vcmask 523744   ;;  %vm15_vm2 = vcmask 490944   ;;  %vm21_vm3 = vcmask 458144   ;;  %s207_s0 = inlined_call_operand.vmem [shape: f32[16,4], index: 0, kind: input, shape index: {}]   ;;  %s208_s1 = inlined_call_operand.vmem [shape: f32[1,64], index: 1, kind: output, shape index: {}]  }
   0x1   :  { %v101_v0 = vld [vmem:[%s207_s0 + $0xf] sm:$0x1]   ;;  %v103_v1 = vld [vmem:[%s207_s0 + $0xd] sm:$0x1]   ;;  %v102_v2 = vld [vmem:[%s207_s0 + $0xe] sm:$0x1]  }
   0x2   :  { %7 = vrot.lane.b32.xlu0 %v101_v0, %s131_s10  ;;  %19 = vrot.lane.b32.xlu1 %v103_v1, %s132_s11  ;;  %v104_v3 = vld [vmem:[%s207_s0 + $0xc] sm:$0x1]   ;;  %s133_s16 = smov 56   ;;  %s134_s17 = smov 48   ;;  %v105_v4 = vld [vmem:[%s207_s0 + $0xb] sm:$0x1]  }
   0x3   :  { %v106_v5 = vld [vmem:[%s207_s0 + $0xa] sm:$0x1]   ;;  %v2_v6 = vld [vmem:[%s207_s0] sm:$0x1]   ;;  %s135_s24 = smov 44   ;;  %s136_s25 = smov 40  }
   0x4   :  { %4 = vst.msk [vmem:[#allocation0] sm:$0x1] %vm3_vm0, %v2_v6   ;;  %v107_v7 = vld [vmem:[%s207_s0 + $0x9] sm:$0x1]   ;;  %v108_v8 = vld [vmem:[%s207_s0 + $0x8] sm:$0x1]  }
   0x5   :  { %s137_s30 = smov 36   ;;  %s138_s2 = smov 32   ;;  %v109_v9 = vld [vmem:[%s207_s0 + $0x7] sm:$0x1]   ;;  %v110_v10 = vld [vmem:[%s207_s0 + $0x6] sm:$0x1]  }
   0x6   :  { %13 = vrot.lane.b32.xlu0 %v102_v2, %s133_s16  ;;  %25 = vrot.lane.b32.xlu1 %v104_v3, %s134_s17  ;;  %s139_s7 = smov 28   ;;  %s140_s8 = smov 24   ;;  %v111_v11 = vld [vmem:[%s207_s0 + $0x5] sm:$0x1]   ;;  %v112_v12 = vld [vmem:[%s207_s0 + $0x4] sm:$0x1]  }
   0x7   :  { %s141_s13 = smov 20   ;;  %s142_s14 = smov 16   ;;  %v113_v13 = vld [vmem:[%s207_s0 + $0x3] sm:$0x1]   ;;  %v114_v14 = vld [vmem:[%s207_s0 + $0x2] sm:$0x1]  }
   0x8   :  { %s143_s19 = smov 12   ;;  %s144_s20 = smov 8   ;;  %v115_v15 = vld [vmem:[%s207_s0 + $0x1] sm:$0x1]   ;;  %vm27_vm4 = vcmask 425344   ;;  %vm33_vm5 = vcmask 392544  }
   0x9   :  { %s145_s0 = smov 4   ;;  %vm39_vm6 = vcmask 359744   ;;  %vm45_vm7 = vcmask 326944   ;;  %vm51_vm8 = vcmask 294144   ;;  %vm57_vm9 = vcmask 261344  }
   0xa   :  { %31 = vrot.lane.b32.xlu0 %v105_v4, %s135_s24  ;;  %37 = vrot.lane.b32.xlu1 %v106_v5, %s136_s25  ;;  %vm63_vm10 = vcmask 228544   ;;  %vm69_vm11 = vcmask 195744   ;;  %vm75_vm12 = vcmask 162944   ;;  %vm81_vm13 = vcmask 130144  }
   0xb   :  { %vm87_vm14 = vcmask 97344   ;;  %vm93_vm15 = vcmask 64544  }
   0xe   :  { %43 = vrot.lane.b32.xlu0 %v107_v7, %s137_s30  ;;  %49 = vrot.lane.b32.xlu1 %v108_v8, %s138_s2 }
  0x12   :  { %55 = vrot.lane.b32.xlu0 %v109_v9, %s139_s7  ;;  %61 = vrot.lane.b32.xlu1 %v110_v10, %s140_s8 }
  0x16   :  { %67 = vrot.lane.b32.xlu0 %v111_v11, %s141_s13  ;;  %73 = vrot.lane.b32.xlu1 %v112_v12, %s142_s14 }
  0x1a   :  { %79 = vrot.lane.b32.xlu0 %v113_v13, %s143_s19  ;;  %85 = vrot.lane.b32.xlu1 %v114_v14, %s144_s20 }
  0x1e   :  { %91 = vrot.lane.b32.xlu0 %v115_v15, %s145_s0 }
  0x74   :  { %v8_v16 = vpop.permute.xlu0 %7   ;;  %v20_v17 = vpop.permute.xlu1 %19  }
  0x75   :  { %10 = vst.msk [vmem:[#allocation0] sm:$0x1] %vm9_vm1, %v8_v16  }
  0x78   :  { %v14_v18 = vpop.permute.xlu0 %13   ;;  %v26_v19 = vpop.permute.xlu1 %25  }
  0x79   :  { %16 = vst.msk [vmem:[#allocation0] sm:$0x1] %vm15_vm2, %v14_v18  }
  0x7a   :  { %22 = vst.msk [vmem:[#allocation0] sm:$0x1] %vm21_vm3, %v20_v17  }
  0x7b   :  { %28 = vst.msk [vmem:[#allocation0] sm:$0x1] %vm27_vm4, %v26_v19  }
  0x7c   :  { %v32_v20 = vpop.permute.xlu0 %31   ;;  %v38_v21 = vpop.permute.xlu1 %37  }
  0x7d   :  { %34 = vst.msk [vmem:[#allocation0] sm:$0x1] %vm33_vm5, %v32_v20  }
  0x7e   :  { %40 = vst.msk [vmem:[#allocation0] sm:$0x1] %vm39_vm6, %v38_v21  }
  0x80   :  { %v44_v22 = vpop.permute.xlu0 %43   ;;  %v50_v23 = vpop.permute.xlu1 %49  }
  0x81   :  { %46 = vst.msk [vmem:[#allocation0] sm:$0x1] %vm45_vm7, %v44_v22  }
  0x82   :  { %52 = vst.msk [vmem:[#allocation0] sm:$0x1] %vm51_vm8, %v50_v23  }
  0x84   :  { %v56_v24 = vpop.permute.xlu0 %55   ;;  %v62_v25 = vpop.permute.xlu1 %61  }
  0x85   :  { %58 = vst.msk [vmem:[#allocation0] sm:$0x1] %vm57_vm9, %v56_v24  }
  0x86   :  { %64 = vst.msk [vmem:[#allocation0] sm:$0x1] %vm63_vm10, %v62_v25  }
  0x88   :  { %v68_v26 = vpop.permute.xlu0 %67   ;;  %v74_v27 = vpop.permute.xlu1 %73  }
  0x89   :  { %70 = vst.msk [vmem:[#allocation0] sm:$0x1] %vm69_vm11, %v68_v26  }
  0x8a   :  { %76 = vst.msk [vmem:[#allocation0] sm:$0x1] %vm75_vm12, %v74_v27  }
  0x8c   :  { %v80_v28 = vpop.permute.xlu0 %79   ;;  %v86_v29 = vpop.permute.xlu1 %85  }
  0x8d   :  { %82 = vst.msk [vmem:[#allocation0] sm:$0x1] %vm81_vm13, %v80_v28  }
  0x8e   :  { %88 = vst.msk [vmem:[#allocation0] sm:$0x1] %vm87_vm14, %v86_v29  }
  0x90   :  { %v92_v30 = vpop.permute.xlu0 %91  }
  0x91   :  { %94 = vst.msk [vmem:[#allocation0] sm:$0x1] %vm93_vm15, %v92_v30  }
  0x98   :  { %v98_v31 = vld [vmem:[#allocation0] sm:$0x1] }
  0x99   :  { %100 = vst [vmem:[%s208_s1] sm:$0x1] %v98_v31 }

// kernel: d_up_block_forward.4
= control target key start
LH: loop header
LB: loop body
LE: loop exit
PB: predicated region body
PF: predicated region fallthrough
CT: control target
= control target key end

     0   :  { %s498_s17 = smov 0   ;;  %s531_s0 = inlined_call_operand.vmem [shape: bf16[128,4], index: 0, kind: input, shape index: {}]   ;;  %s532_s1 = inlined_call_operand.vmem [shape: bf16[4,128], index: 1, kind: input, shape index: {}]   ;;  %s533_s2 = inlined_call_operand.vmem [shape: f32[1,128], index: 2, kind: input, shape index: {}]   ;;  %s534_s3 = inlined_call_operand.<no memory space> [shape: f32[1], index: 3, kind: input, shape index: {}]   ;;  %s535_s4 = inlined_call_operand.vmem [shape: f32[128,128], index: 4, kind: output, shape index: {}]  }
   0x1   :  { %9 = sst [smem:[#allocation2]] %s534_s3 }
   0x2 LB: > { %s411_s18 = sadd.s32 4294967295, %s468_s17   ;;  %p415_p0 = scmp.ge.s32.totalorder %s468_s17, 1  ;;  %s468_s17 = sphi %s498_s17, %s15_s17  }
   0x3   : > { %p164_p1 = scmp.lt.s32.totalorder %s468_s17, 3 }
   0x5   : > { %p165_p2 = pnand %p415_p0, %p164_p1 }
   0x6   : > { %v211_v0 = vld [vmem:[%s532_s1] sm:$0x3] (!%p165_p2)  ;;  %vm252_vm0 = vcmask (!%p165_p2), 1041408   ;;  %s416_s3 = sshll.u32 (!%p165_p2), %s411_s18, 3  ;;  %vm239_vm1 = vcmask (!%p165_p2), 31744   ;;  %s321_s25 = sld [smem:[#allocation2]] (!%p165_p2) }
   0x7   : > { %168 = sbr.rel (%p165_p2) target bundleno = 243 (0xf3), region = 36  ;;  %448 = vmatprep.subr.msk.bf16.mxu0 (!%p165_p2), %vm252_vm0, %v211_v0  ;;  %449 = vmatprep.subr.msk.bf16.mxu1 (!%p165_p2), %vm252_vm0, %v211_v0  ;;  %v254_v1 = vsel (!%p165_p2), %vm252_vm0, %v211_v0, 0  ;;  %p191_p3 = scmp.lt.s32.totalorder (!%p165_p2), %s416_s3, 15  ;;  %v420_v6 = vld [vmem:[%s533_s2] ss:$0 sm:$0xff] (!%p165_p2) }
   0x8   : > { %437 = vmatpush3.bf16.msra.mxu0 (!%p165_p2), %v254_v1  ;;  %447 = vmatpush3.bf16.msra.mxu1 (!%p165_p2), %v254_v1 }
   0xc   : > { %v330_v8 = vstv (!%p165_p2), %s321_s25 }
   0xe   : > { %s537_s3 = smov (!%p191_p3, %s416_s3), 15 }
   0xf   : > { %s417_s21 = sshll.u32 %s537_s3, 2  ;;  %s419_s28 = sshll.u32 %s537_s3, 3 }
  0x10   : > { %s194_s24 = scalar_lea.vmem %s531_s0, %s417_s21  ;;  %s518_s5 = scalar_lea.vmem %s535_s4, %s419_s28 }
  0x11   : > { %v458_v2 = vld [vmem:[%s194_s24] sm:$0xff]   ;;  %v459_v3 = vld [vmem:[%s194_s24 + $0x10] sm:$0xff]   ;;  %v460_v4 = vld [vmem:[%s194_s24 + $0x8] sm:$0xff]  }
  0x12   : > { %438 = vmatprep.mubr.msk.bf16.mxu0 %vm239_vm1, %v458_v2  ;;  %442 = vmatprep.mubr.msk.bf16.mxu1 %vm239_vm1, %v459_v3  ;;  %v461_v5 = vld [vmem:[%s194_s24 + $0x18] sm:$0xff]  }
  0x13   : > { %439 = vmatmul.mubr.msk.bf16.vlgmr.msra.gmra.mrb[0].mxu0 %vm239_vm1, %v460_v4  ;;  %443 = vmatmul.mubr.msk.bf16.vlgmr.msra.gmra.mrb[0].mxu1 %vm239_vm1, %v461_v5 }
  0xe6   : > { %v440_v7 = vpop.f32.mrb[0].mxu0  ;;  %v444_v10 = vpop.f32.mrb[0].mxu1 }
  0xe7   : > { %v299_v9 = vadd.f32 %v440_v7, %v420_v6  ;;  %v290_v11 = vpop.f32.mrb[1].mxu0  ;;  %v315_v12 = vadd.f32 %v444_v10, %v420_v6  ;;  %v306_v14 = vpop.f32.mrb[1].mxu1 }
  0xe8   : > { %v291_v13 = vadd.f32 %v420_v6, %v290_v11  ;;  %v441_v15 = vpop.f32.mrb[2].mxu0  ;;  %v307_v17 = vadd.f32 %v420_v6, %v306_v14  ;;  %v445_v19 = vpop.f32.mrb[2].mxu1 }
  0xe9   : > { %vm324_vm2 = vcmp.ge.f32.partialorder %v299_v9, 0.0  ;;  %v333_v16 = vmul.f32 %v330_v8, %v299_v9  ;;  %v302_v18 = vadd.f32 %v441_v15, %v420_v6  ;;  %v293_v20 = vpop.f32.mrb[3].mxu0  ;;  %vm328_vm3 = vcmp.ge.f32.partialorder %v315_v12, 0.0  ;;  %v309_v23 = vpop.f32.mrb[3].mxu1 }
  0xea   : > { %v337_v21 = vmul.f32 %v330_v8, %v315_v12  ;;  %vm322_vm4 = vcmp.ge.f32.partialorder %v291_v13, 0.0  ;;  %v331_v22 = vmul.f32 %v330_v8, %v291_v13  ;;  %vm326_vm5 = vcmp.ge.f32.partialorder %v307_v17, 0.0 }
  0xeb   : > { %v341_v24 = vsel %vm324_vm2, %v299_v9, %v333_v16  ;;  %v335_v25 = vmul.f32 %v330_v8, %v307_v17  ;;  %vm325_vm6 = vcmp.ge.f32.partialorder %v302_v18, 0.0  ;;  %v334_v28 = vmul.f32 %v330_v8, %v302_v18 }
  0xec   : > { %349 = vst [vmem:[%s518_s5 + $0x10] sm:$0xff] %v341_v24  ;;  %v345_v26 = vsel %vm328_vm3, %v315_v12, %v337_v21  ;;  %v339_v27 = vsel %vm322_vm4, %v291_v13, %v331_v22  ;;  %v318_v29 = vadd.f32 %v445_v19, %v420_v6  ;;  %v294_v31 = vadd.f32 %v420_v6, %v293_v20 }
  0xed   : > { %353 = vst [vmem:[%s518_s5 + $0x30] sm:$0xff] %v345_v26  ;;  %347 = vst [vmem:[%s518_s5] sm:$0xff] %v339_v27  ;;  %v343_v30 = vsel %vm326_vm5, %v307_v17, %v335_v25  ;;  %v310_v32 = vadd.f32 %v420_v6, %v309_v23  ;;  %v342_v33 = vsel %vm325_vm6, %v302_v18, %v334_v28 }
  0xee   : > { %351 = vst [vmem:[%s518_s5 + $0x20] sm:$0xff] %v343_v30  ;;  %vm329_vm7 = vcmp.ge.f32.partialorder %v318_v29, 0.0  ;;  %v338_v34 = vmul.f32 %v330_v8, %v318_v29  ;;  %350 = vst [vmem:[%s518_s5 + $0x18] sm:$0xff] %v342_v33  ;;  %vm323_vm8 = vcmp.ge.f32.partialorder %v294_v31, 0.0  ;;  %v332_v35 = vmul.f32 %v330_v8, %v294_v31 }
  0xef   : > { %vm327_vm9 = vcmp.ge.f32.partialorder %v310_v32, 0.0  ;;  %v336_v36 = vmul.f32 %v330_v8, %v310_v32 }
  0xf0   : > { %v346_v37 = vsel %vm329_vm7, %v318_v29, %v338_v34  ;;  %v340_v38 = vsel %vm323_vm8, %v294_v31, %v332_v35 }
  0xf1   : > { %354 = vst [vmem:[%s518_s5 + $0x38] sm:$0xff] %v346_v37  ;;  %v344_v39 = vsel %vm327_vm9, %v310_v32, %v336_v36  ;;  %348 = vst [vmem:[%s518_s5 + $0x8] sm:$0xff] %v340_v38 }
  0xf2   : > { %352 = vst [vmem:[%s518_s5 + $0x28] sm:$0xff] %v344_v39 }
  0xf3 PF: > { %s15_s17 = sadd.s32 1, %s468_s17  }
  0xf4   : > { %p12_p4 = scmp.ge.s32.totalorder %s15_s17, 4  }
  0xf6   :  { %14 = sbr.rel (!%p12_p4) target bundleno = 2 (0x2), region = 66 }

// kernel: d_up_block_forward.5
= control target key start
LH: loop header
LB: loop body
LE: loop exit
PB: predicated region body
PF: predicated region fallthrough
CT: control target
= control target key end

     0   :  { %s533_s17 = smov 0   ;;  %s576_s0 = inlined_call_operand.vmem [shape: bf16[128,36], index: 0, kind: input, shape index: {}]   ;;  %s577_s1 = inlined_call_operand.vmem [shape: bf16[36,128], index: 1, kind: input, shape index: {}]   ;;  %s578_s2 = inlined_call_operand.vmem [shape: f32[1,128], index: 2, kind: input, shape index: {}]   ;;  %s579_s3 = inlined_call_operand.<no memory space> [shape: f32[1], index: 3, kind: input, shape index: {}]   ;;  %s580_s4 = inlined_call_operand.vmem [shape: f32[128,128], index: 4, kind: output, shape index: {}]  }
   0x1   :  { %9 = sst [smem:[#allocation2]] %s579_s3 }
   0x2 LB: > { %s430_s18 = sadd.s32 4294967295, %s503_s17   ;;  %p434_p0 = scmp.ge.s32.totalorder %s503_s17, 1  ;;  %s503_s17 = sphi %s533_s17, %s15_s17  }
   0x3   : > { %p164_p1 = scmp.lt.s32.totalorder %s503_s17, 3 }
   0x5   : > { %p165_p2 = pnand %p434_p0, %p164_p1 }
   0x6   : > { %v490_v0 = vld [vmem:[%s577_s1] sm:$0xff] (!%p165_p2)   ;;  %v491_v1 = vld [vmem:[%s577_s1 + $0x8] sm:$0xff] (!%p165_p2)   ;;  %s435_s22 = sshll.u32 (!%p165_p2), %s430_s18, 3  ;;  %v492_v2 = vld [vmem:[%s577_s1 + $0x10] ss:$0 sps:$4 sm:$0x33] (!%p165_p2)  }
   0x7   : > { %168 = sbr.rel (%p165_p2) target bundleno = 243 (0xf3), region = 36  ;;  %460 = vmatprep.subr.bf16.mxu0 (!%p165_p2), %v490_v0  ;;  %474 = vmatprep.subr.bf16.mxu1 (!%p165_p2), %v490_v0  ;;  %p191_p3 = scmp.lt.s32.totalorder (!%p165_p2), %s435_s22, 15  ;;  %vm271_vm0 = vcmask (!%p165_p2), 1041408   ;;  %vm258_vm1 = vcmask (!%p165_p2), 293888   ;;  %v439_v8 = vld [vmem:[%s578_s2] ss:$0 sm:$0xff] (!%p165_p2) }
   0x8   : > { %461 = vmatpush3.bf16.msra.mxu0 (!%p165_p2), %v490_v0  ;;  %477 = vmatpush3.bf16.msra.mxu1 (!%p165_p2), %v490_v0  ;;  %v273_v3 = vsel (!%p165_p2), %vm271_vm0, %v492_v2, 0  ;;  %s340_s29 = sld [smem:[#allocation2]] (!%p165_p2) }
   0x9   : > { %462 = vmatprep.subr.bf16.mxu0 (!%p165_p2), %v491_v1  ;;  %475 = vmatprep.subr.bf16.mxu1 (!%p165_p2), %v491_v1 }
   0xc   : > { %463 = vmatpush3.bf16.msra.mxu0 (!%p165_p2), %v491_v1  ;;  %478 = vmatpush3.bf16.msra.mxu1 (!%p165_p2), %v491_v1 }
   0xd   : > { %480 = vmatprep.subr.msk.bf16.mxu0 (!%p165_p2), %vm271_vm0, %v492_v2  ;;  %481 = vmatprep.subr.msk.bf16.mxu1 (!%p165_p2), %vm271_vm0, %v492_v2 }
   0xe   : > { %s582_s22 = smov (!%p191_p3, %s435_s22), 15  ;;  %v349_v10 = vstv %s340_s29 }
   0xf   : > { %s436_s25 = sshll.u32 %s582_s22, 2  ;;  %s438_s6 = sshll.u32 %s582_s22, 3 }
  0x10   : > { %s194_s28 = scalar_lea.vmem %s576_s0, %s436_s25  ;;  %465 = vmatpush3.bf16.msra.mxu0 %v273_v3  ;;  %479 = vmatpush3.bf16.msra.mxu1 %v273_v3  ;;  %s563_s9 = scalar_lea.vmem %s580_s4, %s438_s6 }
  0x11   : > { %v493_v4 = vld [vmem:[%s194_s28] sm:$0xff]   ;;  %v494_v5 = vld [vmem:[%s194_s28 + $0x10] sm:$0xff]   ;;  %v495_v6 = vld [vmem:[%s194_s28 + $0x8] sm:$0xff]  }
  0x12   : > { %466 = vmatprep.mubr.msk.bf16.mxu0 %vm258_vm1, %v493_v4  ;;  %v496_v7 = vld [vmem:[%s194_s28 + $0x18] sm:$0xff]   ;;  %470 = vmatprep.mubr.msk.bf16.mxu1 %vm258_vm1, %v494_v5 }
  0x13   : > { %467 = vmatmul.mubr.msk.bf16.vlgmr.msra.gmra.mrb[0].mxu0 %vm258_vm1, %v495_v6  ;;  %471 = vmatmul.mubr.msk.bf16.vlgmr.msra.gmra.mrb[0].mxu1 %vm258_vm1, %v496_v7 }
  0xe6   : > { %v468_v9 = vpop.f32.mrb[0].mxu0  ;;  %v472_v11 = vpop.f32.mrb[0].mxu1 }
  0xe7   : > { %v318_v12 = vadd.f32 %v468_v9, %v439_v8  ;;  %v334_v13 = vadd.f32 %v472_v11, %v439_v8  ;;  %v309_v14 = vpop.f32.mrb[1].mxu0  ;;  %v325_v15 = vpop.f32.mrb[1].mxu1 }
  0xe8   : > { %v310_v16 = vadd.f32 %v439_v8, %v309_v14  ;;  %v326_v17 = vadd.f32 %v439_v8, %v325_v15  ;;  %v469_v18 = vpop.f32.mrb[2].mxu0  ;;  %v473_v19 = vpop.f32.mrb[2].mxu1 }
  0xe9   : > { %vm343_vm2 = vcmp.ge.f32.partialorder %v318_v12, 0.0  ;;  %v352_v20 = vmul.f32 %v349_v10, %v318_v12  ;;  %vm347_vm3 = vcmp.ge.f32.partialorder %v334_v13, 0.0  ;;  %v356_v21 = vmul.f32 %v349_v10, %v334_v13  ;;  %v312_v22 = vpop.f32.mrb[3].mxu0  ;;  %v328_v23 = vpop.f32.mrb[3].mxu1 }
  0xea   : > { %vm341_vm4 = vcmp.ge.f32.partialorder %v310_v16, 0.0  ;;  %v350_v24 = vmul.f32 %v349_v10, %v310_v16  ;;  %vm345_vm5 = vcmp.ge.f32.partialorder %v326_v17, 0.0  ;;  %v354_v25 = vmul.f32 %v349_v10, %v326_v17 }
  0xeb   : > { %v360_v26 = vsel %vm343_vm2, %v318_v12, %v352_v20  ;;  %v364_v27 = vsel %vm347_vm3, %v334_v13, %v356_v21  ;;  %v321_v28 = vadd.f32 %v469_v18, %v439_v8  ;;  %v337_v29 = vadd.f32 %v473_v19, %v439_v8 }
  0xec   : > { %368 = vst [vmem:[%s563_s9 + $0x10] sm:$0xff] %v360_v26  ;;  %372 = vst [vmem:[%s563_s9 + $0x30] sm:$0xff] %v364_v27  ;;  %v358_v30 = vsel %vm341_vm4, %v310_v16, %v350_v24  ;;  %v362_v31 = vsel %vm345_vm5, %v326_v17, %v354_v25  ;;  %v313_v32 = vadd.f32 %v439_v8, %v312_v22 }
  0xed   : > { %v329_v33 = vadd.f32 %v439_v8, %v328_v23  ;;  %366 = vst [vmem:[%s563_s9] sm:$0xff] %v358_v30  ;;  %370 = vst [vmem:[%s563_s9 + $0x20] sm:$0xff] %v362_v31  ;;  %vm344_vm6 = vcmp.ge.f32.partialorder %v321_v28, 0.0  ;;  %v353_v34 = vmul.f32 %v349_v10, %v321_v28  ;;  %vm348_vm7 = vcmp.ge.f32.partialorder %v337_v29, 0.0 }
  0xee   : > { %v357_v35 = vmul.f32 %v349_v10, %v337_v29  ;;  %vm342_vm8 = vcmp.ge.f32.partialorder %v313_v32, 0.0  ;;  %v351_v36 = vmul.f32 %v349_v10, %v313_v32 }
  0xef   : > { %vm346_vm9 = vcmp.ge.f32.partialorder %v329_v33, 0.0  ;;  %v355_v37 = vmul.f32 %v349_v10, %v329_v33  ;;  %v361_v38 = vsel %vm344_vm6, %v321_v28, %v353_v34 }
  0xf0   : > { %v365_v39 = vsel %vm348_vm7, %v337_v29, %v357_v35  ;;  %369 = vst [vmem:[%s563_s9 + $0x18] sm:$0xff] %v361_v38  ;;  %v359_v40 = vsel %vm342_vm8, %v313_v32, %v351_v36 }
  0xf1   : > { %373 = vst [vmem:[%s563_s9 + $0x38] sm:$0xff] %v365_v39  ;;  %v363_v41 = vsel %vm346_vm9, %v329_v33, %v355_v37  ;;  %367 = vst [vmem:[%s563_s9 + $0x8] sm:$0xff] %v359_v40 }
  0xf2   : > { %371 = vst [vmem:[%s563_s9 + $0x28] sm:$0xff] %v363_v41 }
  0xf3 PF: > { %s15_s17 = sadd.s32 1, %s503_s17  }
  0xf4   : > { %p12_p4 = scmp.ge.s32.totalorder %s15_s17, 4  }
  0xf6   :  { %14 = sbr.rel (!%p12_p4) target bundleno = 2 (0x2), region = 66 }

// kernel: d_up_block_forward.6
= control target key start
LH: loop header
LB: loop body
LE: loop exit
PB: predicated region body
PF: predicated region fallthrough
CT: control target
= control target key end

     0   :  { %s794_s20 = smov 0   ;;  %s920_s0 = inlined_call_operand.vmem [shape: bf16[128,256], index: 0, kind: input, shape index: {}]   ;;  %s921_s1 = inlined_call_operand.vmem [shape: bf16[256,128], index: 1, kind: input, shape index: {}]   ;;  %s922_s2 = inlined_call_operand.vmem [shape: f32[1,128], index: 2, kind: input, shape index: {}]   ;;  %s923_s3 = inlined_call_operand.<no memory space> [shape: f32[1], index: 3, kind: input, shape index: {}]   ;;  %s924_s4 = inlined_call_operand.vmem [shape: f32[128,128], index: 4, kind: input, shape index: {}]   ;;  %s925_s5 = inlined_call_operand.vmem [shape: f32[128,128], index: 5, kind: output, shape index: {}]  }
   0x1   :  { %10 = sst [smem:[#allocation2]] %s923_s3 }
   0x2 LB: > { %s621_s21 = sadd.s32 4294967295, %s759_s20   ;;  %p625_p0 = scmp.ge.s32.totalorder %s759_s20, 1  ;;  %s759_s20 = sphi %s794_s20, %s16_s20  }
   0x3   : > { %p201_p1 = scmp.lt.s32.totalorder %s759_s20, 3 }
   0x5   : > { %p202_p2 = pnand %p625_p0, %p201_p1 }
   0x6   : > { %v725_v0 = vld [vmem:[%s921_s1 + $0x40] sm:$0xff] (!%p202_p2)   ;;  %s626_s3 = sshll.u32 (!%p202_p2), %s621_s21, 3  ;;  %v727_v2 = vld [vmem:[%s921_s1 + $0x48] sm:$0xff] (!%p202_p2)   ;;  %v729_v4 = vld [vmem:[%s921_s1 + $0x50] sm:$0xff] (!%p202_p2)   ;;  %s503_s8 = sld [smem:[#allocation2]] (!%p202_p2) }
   0x7   : > { %205 = sbr.rel (%p202_p2) target bundleno = 274 (0x112), region = 40  ;;  %v726_v1 = vld [vmem:[%s921_s1] sm:$0xff] (!%p202_p2)   ;;  %661 = vmatprep.subr.bf16.mxu0 (!%p202_p2), %v725_v0  ;;  %701 = vmatprep.subr.bf16.mxu1 (!%p202_p2), %v725_v0  ;;  %v728_v3 = vld [vmem:[%s921_s1 + $0x8] sm:$0xff] (!%p202_p2)   ;;  %p236_p3 = scmp.lt.s32.totalorder (!%p202_p2), %s626_s3, 15  ;;  %v730_v5 = vld [vmem:[%s921_s1 + $0x10] sm:$0xff] (!%p202_p2)  }
   0x8   : > { %662 = vmatpush3.bf16.msra.mxu0 (!%p202_p2), %v726_v1  ;;  %709 = vmatpush3.bf16.msra.mxu1 (!%p202_p2), %v726_v1  ;;  %v731_v6 = vld [vmem:[%s921_s1 + $0x58] sm:$0xff] (!%p202_p2)   ;;  %v733_v8 = vld [vmem:[%s921_s1 + $0x60] sm:$0xff] (!%p202_p2)   ;;  %v735_v10 = vld [vmem:[%s921_s1 + $0x68] sm:$0xff] (!%p202_p2)  }
   0x9   : > { %663 = vmatprep.subr.bf16.mxu0 (!%p202_p2), %v727_v2  ;;  %702 = vmatprep.subr.bf16.mxu1 (!%p202_p2), %v727_v2  ;;  %v732_v7 = vld [vmem:[%s921_s1 + $0x18] sm:$0xff] (!%p202_p2)   ;;  %v734_v9 = vld [vmem:[%s921_s1 + $0x20] sm:$0xff] (!%p202_p2)   ;;  %v736_v13 = vld [vmem:[%s921_s1 + $0x28] sm:$0xff] (!%p202_p2)  }
   0xa   : > { %v737_v14 = vld [vmem:[%s921_s1 + $0x70] sm:$0xff] (!%p202_p2)   ;;  %v739_v16 = vld [vmem:[%s921_s1 + $0x78] sm:$0xff] (!%p202_p2)   ;;  %v869_v26 = vld [vmem:[%s922_s2] ss:$0 sm:$0xff] (!%p202_p2) }
   0xb   : > { %v738_v15 = vld [vmem:[%s921_s1 + $0x30] sm:$0xff] (!%p202_p2)   ;;  %v740_v17 = vld [vmem:[%s921_s1 + $0x38] sm:$0xff] (!%p202_p2)  }
   0xc   : > { %664 = vmatpush3.bf16.msra.mxu0 (!%p202_p2), %v728_v3  ;;  %710 = vmatpush3.bf16.msra.mxu1 (!%p202_p2), %v728_v3  ;;  %v877_v33 = vstv (!%p202_p2), %s503_s8 }
   0xd   : > { %665 = vmatprep.subr.bf16.mxu0 (!%p202_p2), %v729_v4  ;;  %703 = vmatprep.subr.bf16.mxu1 (!%p202_p2), %v729_v4 }
   0xe   : > { %s927_s3 = smov (!%p236_p3, %s626_s3), 15 }
   0xf   : > { %s826_s13 = sshll.u32 %s927_s3, 3 }
  0x10   : > { %666 = vmatpush3.bf16.msra.mxu0 %v730_v5  ;;  %711 = vmatpush3.bf16.msra.mxu1 %v730_v5  ;;  %s835_s18 = scalar_lea.vmem %s920_s0, %s826_s13  ;;  %s875_s14 = scalar_lea.vmem %s924_s4, %s826_s13 }
  0x11   : > { %667 = vmatprep.subr.bf16.mxu0 %v731_v6  ;;  %704 = vmatprep.subr.bf16.mxu1 %v731_v6  ;;  %v743_v11 = vld [vmem:[%s835_s18 + $0x4] ss:$8 sps:$4 sm:$0xff]   ;;  %v741_v18 = vld [vmem:[%s835_s18] ss:$8 sps:$4 sm:$0xff]   ;;  %v747_v20 = vld [vmem:[%s835_s18 + $0x14] ss:$8 sps:$4 sm:$0xff]   ;;  %s891_s17 = scalar_lea.vmem %s925_s5, %s826_s13 }
  0x12   : > { %v746_v12 = vld [vmem:[%s835_s18 + $0x24] ss:$8 sps:$4 sm:$0xff]   ;;  %470 = vmatprep.mubr.bf16.mxu0 %v743_v11  ;;  %v744_v19 = vld [vmem:[%s835_s18 + $0x20] ss:$8 sps:$4 sm:$0xff]   ;;  %v749_v21 = vld [vmem:[%s835_s18 + $0x34] ss:$8 sps:$4 sm:$0xff]  }
  0x13   : > { %486 = vmatprep.mubr.bf16.mxu1 %v746_v12  ;;  %v751_v22 = vld [vmem:[%s835_s18 + $0x10] ss:$8 sps:$4 sm:$0xff]   ;;  %v529_v41 = vld [vmem:[%s875_s14] sm:$0xff]  ;;  %v530_v53 = vld [vmem:[%s875_s14 + $0x8] sm:$0xff] }
  0x14   : > { %668 = vmatpush3.bf16.msra.mxu0 %v732_v7  ;;  %712 = vmatpush3.bf16.msra.mxu1 %v732_v7  ;;  %v752_v23 = vld [vmem:[%s835_s18 + $0x30] ss:$8 sps:$4 sm:$0xff]   ;;  %v533_v43 = vld [vmem:[%s875_s14 + $0x20] sm:$0xff]  ;;  %v534_v57 = vld [vmem:[%s875_s14 + $0x28] sm:$0xff] }
  0x15   : > { %669 = vmatprep.subr.bf16.mxu0 %v733_v8  ;;  %705 = vmatprep.subr.bf16.mxu1 %v733_v8  ;;  %v535_v11 = vld [vmem:[%s875_s14 + $0x30] sm:$0xff] }
  0x18   : > { %670 = vmatpush3.bf16.msra.mxu0 %v734_v9  ;;  %713 = vmatpush3.bf16.msra.mxu1 %v734_v9  ;;  %v531_v9 = vld [vmem:[%s875_s14 + $0x10] sm:$0xff] }
  0x19   : > { %671 = vmatprep.subr.bf16.mxu0 %v735_v10  ;;  %706 = vmatprep.subr.bf16.mxu1 %v735_v10 }
  0x1c   : > { %672 = vmatpush3.bf16.msra.mxu0 %v736_v13  ;;  %714 = vmatpush3.bf16.msra.mxu1 %v736_v13 }
  0x1d   : > { %673 = vmatprep.subr.bf16.mxu0 %v737_v14  ;;  %707 = vmatprep.subr.bf16.mxu1 %v737_v14 }
  0x20   : > { %674 = vmatpush3.bf16.msra.mxu0 %v738_v15  ;;  %715 = vmatpush3.bf16.msra.mxu1 %v738_v15 }
  0x21   : > { %675 = vmatprep.subr.bf16.mxu0 %v739_v16  ;;  %708 = vmatprep.subr.bf16.mxu1 %v739_v16 }
  0x24   : > { %676 = vmatpush3.bf16.msra.mxu0 %v740_v17  ;;  %716 = vmatpush3.bf16.msra.mxu1 %v740_v17 }
  0x27   : > { %471 = vmatmul.mubr.bf16.vlgmr.msra.gmra.mrb[0].mxu0 %v741_v18  ;;  %487 = vmatmul.mubr.bf16.vlgmr.msra.gmra.mrb[0].mxu1 %v744_v19  ;;  %v532_v19 = vld [vmem:[%s875_s14 + $0x18] sm:$0xff] }
  0x28   : > { %478 = vmatprep.mubr.bf16.mxu0 %v747_v20  ;;  %494 = vmatprep.mubr.bf16.mxu1 %v749_v21  ;;  %v536_v21 = vld [vmem:[%s875_s14 + $0x38] sm:$0xff] }
  0x2f   : > { %479 = vmatmul.mubr.bf16.gmra.mrb[4].mxu0 %v751_v22  ;;  %495 = vmatmul.mubr.bf16.gmra.mrb[4].mxu1 %v752_v23 }
  0xfa   : > { %v677_v24 = vpop.f32.mrb[0].mxu0  ;;  %v689_v25 = vpop.f32.mrb[0].mxu1 }
  0xfb   : > { %v678_v27 = vpop.f32.mrb[1].mxu0  ;;  %v690_v28 = vpop.f32.mrb[1].mxu1 }
  0xfc   : > { %v679_v29 = vadd.f32 %v678_v27, %v677_v24  ;;  %v691_v30 = vadd.f32 %v690_v28, %v689_v25  ;;  %v680_v31 = vpop.f32.mrb[2].mxu0  ;;  %v692_v32 = vpop.f32.mrb[2].mxu1 }
  0xfd   : > { %v681_v34 = vpop.f32.mrb[3].mxu0  ;;  %v693_v35 = vpop.f32.mrb[3].mxu1 }
  0xfe   : > { %v473_v36 = vadd.f32 %v679_v29, %v869_v26  ;;  %v489_v37 = vadd.f32 %v691_v30, %v869_v26  ;;  %v682_v38 = vadd.f32 %v681_v34, %v680_v31  ;;  %v694_v39 = vadd.f32 %v693_v35, %v692_v32 }
 0x100   : > { %vm504_vm0 = vcmp.ge.f32.partialorder %v473_v36, 0.0  ;;  %v513_v40 = vmul.f32 %v877_v33, %v473_v36  ;;  %vm508_vm1 = vcmp.ge.f32.partialorder %v489_v37, 0.0  ;;  %v517_v42 = vmul.f32 %v877_v33, %v489_v37 }
 0x101   : > { %v476_v44 = vadd.f32 %v682_v38, %v869_v26  ;;  %v492_v45 = vadd.f32 %v694_v39, %v869_v26 }
 0x102   : > { %v521_v46 = vsel %vm504_vm0, %v473_v36, %v513_v40  ;;  %v525_v47 = vsel %vm508_vm1, %v489_v37, %v517_v42  ;;  %v683_v48 = vpop.f32.mrb[4].mxu0  ;;  %v695_v49 = vpop.f32.mrb[4].mxu1 }
 0x103   : > { %v537_v50 = vsub.f32 %v521_v46, %v529_v41  ;;  %v541_v51 = vsub.f32 %v525_v47, %v533_v43  ;;  %vm505_vm2 = vcmp.ge.f32.partialorder %v476_v44, 0.0  ;;  %v514_v52 = vmul.f32 %v877_v33, %v476_v44  ;;  %v684_v54 = vpop.f32.mrb[5].mxu0  ;;  %v696_v55 = vpop.f32.mrb[5].mxu1 }
 0x104   : > { %vm509_vm3 = vcmp.ge.f32.partialorder %v492_v45, 0.0  ;;  %v518_v56 = vmul.f32 %v877_v33, %v492_v45  ;;  %v685_v58 = vadd.f32 %v684_v54, %v683_v48  ;;  %v697_v59 = vadd.f32 %v696_v55, %v695_v49  ;;  %v686_v60 = vpop.f32.mrb[6].mxu0  ;;  %v698_v61 = vpop.f32.mrb[6].mxu1 }
 0x105   : > { %545 = vst [vmem:[%s891_s17] sm:$0xff] %v537_v50  ;;  %549 = vst [vmem:[%s891_s17 + $0x20] sm:$0xff] %v541_v51  ;;  %v522_v62 = vsel %vm505_vm2, %v476_v44, %v514_v52  ;;  %v687_v63 = vpop.f32.mrb[7].mxu0  ;;  %v699_v0 = vpop.f32.mrb[7].mxu1 }
 0x106   : > { %v538_v1 = vsub.f32 %v522_v62, %v530_v53  ;;  %v526_v2 = vsel %vm509_vm3, %v492_v45, %v518_v56  ;;  %v481_v3 = vadd.f32 %v685_v58, %v869_v26  ;;  %v497_v4 = vadd.f32 %v697_v59, %v869_v26 }
 0x107   : > { %v542_v5 = vsub.f32 %v526_v2, %v534_v57  ;;  %v688_v6 = vadd.f32 %v687_v63, %v686_v60  ;;  %v700_v7 = vadd.f32 %v699_v0, %v698_v61 }
 0x108   : > { %546 = vst [vmem:[%s891_s17 + $0x8] sm:$0xff] %v538_v1  ;;  %vm506_vm4 = vcmp.ge.f32.partialorder %v481_v3, 0.0  ;;  %v515_v8 = vmul.f32 %v877_v33, %v481_v3  ;;  %vm510_vm5 = vcmp.ge.f32.partialorder %v497_v4, 0.0  ;;  %v519_v10 = vmul.f32 %v877_v33, %v497_v4 }
 0x109   : > { %550 = vst [vmem:[%s891_s17 + $0x28] sm:$0xff] %v542_v5  ;;  %v484_v12 = vadd.f32 %v688_v6, %v869_v26  ;;  %v500_v13 = vadd.f32 %v700_v7, %v869_v26 }
 0x10a   : > { %v523_v14 = vsel %vm506_vm4, %v481_v3, %v515_v8  ;;  %v527_v15 = vsel %vm510_vm5, %v497_v4, %v519_v10 }
 0x10b   : > { %v539_v16 = vsub.f32 %v523_v14, %v531_v9  ;;  %v543_v17 = vsub.f32 %v527_v15, %v535_v11  ;;  %vm507_vm6 = vcmp.ge.f32.partialorder %v484_v12, 0.0  ;;  %v516_v18 = vmul.f32 %v877_v33, %v484_v12 }
 0x10c   : > { %vm511_vm7 = vcmp.ge.f32.partialorder %v500_v13, 0.0  ;;  %v520_v20 = vmul.f32 %v877_v33, %v500_v13 }
 0x10d   : > { %547 = vst [vmem:[%s891_s17 + $0x10] sm:$0xff] %v539_v16  ;;  %551 = vst [vmem:[%s891_s17 + $0x30] sm:$0xff] %v543_v17  ;;  %v524_v22 = vsel %vm507_vm6, %v484_v12, %v516_v18 }
 0x10e   : > { %v540_v23 = vsub.f32 %v524_v22, %v532_v19  ;;  %v528_v24 = vsel %vm511_vm7, %v500_v13, %v520_v20 }
 0x10f   : > { %v544_v25 = vsub.f32 %v528_v24, %v536_v21 }
 0x110   : > { %548 = vst [vmem:[%s891_s17 + $0x18] sm:$0xff] %v540_v23 }
 0x111   : > { %552 = vst [vmem:[%s891_s17 + $0x38] sm:$0xff] %v544_v25 }
 0x112 PF: > { %s16_s20 = sadd.s32 1, %s759_s20  }
 0x113   : > { %p13_p4 = scmp.ge.s32.totalorder %s16_s20, 4  }
 0x115   :  { %15 = sbr.rel (!%p13_p4) target bundleno = 2 (0x2), region = 73 }

// kernel: d_up_block_forward.7
= control target key start
LH: loop header
LB: loop body
LE: loop exit
PB: predicated region body
PF: predicated region fallthrough
CT: control target
= control target key end

     0   :  { %s617_s20 = smov 0   ;;  %s673_s0 = inlined_call_operand.vmem [shape: bf16[128,36], index: 0, kind: input, shape index: {}]   ;;  %s674_s1 = inlined_call_operand.vmem [shape: bf16[36,128], index: 1, kind: input, shape index: {}]   ;;  %s675_s2 = inlined_call_operand.vmem [shape: f32[1,128], index: 2, kind: input, shape index: {}]   ;;  %s676_s3 = inlined_call_operand.<no memory space> [shape: f32[1], index: 3, kind: input, shape index: {}]   ;;  %s677_s4 = inlined_call_operand.vmem [shape: f32[128,128], index: 4, kind: input, shape index: {}]   ;;  %s678_s5 = inlined_call_operand.vmem [shape: f32[128,128], index: 5, kind: output, shape index: {}]  }
   0x1   :  { %10 = sst [smem:[#allocation2]] %s676_s3 }
   0x2 LB: > { %s507_s21 = sadd.s32 4294967295, %s582_s20   ;;  %p511_p0 = scmp.ge.s32.totalorder %s582_s20, 1  ;;  %s582_s20 = sphi %s617_s20, %s16_s20  }
   0x3   : > { %p200_p1 = scmp.lt.s32.totalorder %s582_s20, 3 }
   0x5   : > { %p201_p2 = pnand %p511_p0, %p200_p1 }
   0x6   : > { %v569_v0 = vld [vmem:[%s674_s1] sm:$0xff] (!%p201_p2)   ;;  %v570_v1 = vld [vmem:[%s674_s1 + $0x8] sm:$0xff] (!%p201_p2)   ;;  %s512_s25 = sshll.u32 (!%p201_p2), %s507_s21, 3  ;;  %v571_v2 = vld [vmem:[%s674_s1 + $0x10] ss:$0 sps:$4 sm:$0x33] (!%p201_p2)  }
   0x7   : > { %204 = sbr.rel (%p201_p2) target bundleno = 247 (0xf7), region = 40  ;;  %539 = vmatprep.subr.bf16.mxu0 (!%p201_p2), %v569_v0  ;;  %553 = vmatprep.subr.bf16.mxu1 (!%p201_p2), %v569_v0  ;;  %p234_p3 = scmp.lt.s32.totalorder (!%p201_p2), %s512_s25, 15  ;;  %vm320_vm0 = vcmask (!%p201_p2), 1041408   ;;  %vm307_vm1 = vcmask (!%p201_p2), 293888   ;;  %v518_v8 = vld [vmem:[%s675_s2] ss:$0 sm:$0xff] (!%p201_p2) }
   0x8   : > { %540 = vmatpush3.bf16.msra.mxu0 (!%p201_p2), %v569_v0  ;;  %556 = vmatpush3.bf16.msra.mxu1 (!%p201_p2), %v569_v0  ;;  %v322_v3 = vsel (!%p201_p2), %vm320_vm0, %v571_v2, 0  ;;  %s389_s7 = sld [smem:[#allocation2]] (!%p201_p2) }
   0x9   : > { %541 = vmatprep.subr.bf16.mxu0 (!%p201_p2), %v570_v1  ;;  %554 = vmatprep.subr.bf16.mxu1 (!%p201_p2), %v570_v1 }
   0xc   : > { %542 = vmatpush3.bf16.msra.mxu0 (!%p201_p2), %v570_v1  ;;  %557 = vmatpush3.bf16.msra.mxu1 (!%p201_p2), %v570_v1 }
   0xd   : > { %559 = vmatprep.subr.msk.bf16.mxu0 (!%p201_p2), %vm320_vm0, %v571_v2  ;;  %560 = vmatprep.subr.msk.bf16.mxu1 (!%p201_p2), %vm320_vm0, %v571_v2 }
   0xe   : > { %s680_s25 = smov (!%p234_p3, %s512_s25), 15  ;;  %v398_v10 = vstv %s389_s7 }
   0xf   : > { %s513_s28 = sshll.u32 %s680_s25, 2  ;;  %s515_s8 = sshll.u32 %s680_s25, 3 }
  0x10   : > { %s237_s6 = scalar_lea.vmem %s673_s0, %s513_s28  ;;  %544 = vmatpush3.bf16.msra.mxu0 %v322_v3  ;;  %558 = vmatpush3.bf16.msra.mxu1 %v322_v3  ;;  %s647_s13 = scalar_lea.vmem %s677_s4, %s515_s8 }
  0x11   : > { %v572_v4 = vld [vmem:[%s237_s6] sm:$0xff]   ;;  %v573_v5 = vld [vmem:[%s237_s6 + $0x10] sm:$0xff]   ;;  %v574_v6 = vld [vmem:[%s237_s6 + $0x8] sm:$0xff]   ;;  %s656_s16 = scalar_lea.vmem %s678_s5, %s515_s8 }
  0x12   : > { %545 = vmatprep.mubr.msk.bf16.mxu0 %vm307_vm1, %v572_v4  ;;  %v575_v7 = vld [vmem:[%s237_s6 + $0x18] sm:$0xff]   ;;  %549 = vmatprep.mubr.msk.bf16.mxu1 %vm307_vm1, %v573_v5  ;;  %v417_v21 = vld [vmem:[%s647_s13 + $0x10] sm:$0xff]  ;;  %v415_v27 = vld [vmem:[%s647_s13] sm:$0xff] }
  0x13   : > { %546 = vmatmul.mubr.msk.bf16.vlgmr.msra.gmra.mrb[0].mxu0 %vm307_vm1, %v574_v6  ;;  %550 = vmatmul.mubr.msk.bf16.vlgmr.msra.gmra.mrb[0].mxu1 %vm307_vm1, %v575_v7  ;;  %v421_v23 = vld [vmem:[%s647_s13 + $0x30] sm:$0xff]  ;;  %v419_v29 = vld [vmem:[%s647_s13 + $0x20] sm:$0xff]  ;;  %v418_v41 = vld [vmem:[%s647_s13 + $0x18] sm:$0xff] }
  0x14   : > { %v422_v43 = vld [vmem:[%s647_s13 + $0x38] sm:$0xff]  ;;  %v416_v50 = vld [vmem:[%s647_s13 + $0x8] sm:$0xff] }
  0x15   : > { %v420_v53 = vld [vmem:[%s647_s13 + $0x28] sm:$0xff] }
  0xe6   : > { %v547_v9 = vpop.f32.mrb[0].mxu0  ;;  %v551_v11 = vpop.f32.mrb[0].mxu1 }
  0xe7   : > { %v367_v12 = vadd.f32 %v547_v9, %v518_v8  ;;  %v383_v13 = vadd.f32 %v551_v11, %v518_v8  ;;  %v358_v14 = vpop.f32.mrb[1].mxu0  ;;  %v374_v15 = vpop.f32.mrb[1].mxu1 }
  0xe8   : > { %v359_v16 = vadd.f32 %v518_v8, %v358_v14  ;;  %v375_v17 = vadd.f32 %v518_v8, %v374_v15  ;;  %v548_v18 = vpop.f32.mrb[2].mxu0  ;;  %v552_v19 = vpop.f32.mrb[2].mxu1 }
  0xe9   : > { %vm392_vm2 = vcmp.ge.f32.partialorder %v367_v12, 0.0  ;;  %v401_v20 = vmul.f32 %v398_v10, %v367_v12  ;;  %vm396_vm3 = vcmp.ge.f32.partialorder %v383_v13, 0.0  ;;  %v405_v22 = vmul.f32 %v398_v10, %v383_v13  ;;  %v361_v24 = vpop.f32.mrb[3].mxu0  ;;  %v377_v25 = vpop.f32.mrb[3].mxu1 }
  0xea   : > { %vm390_vm4 = vcmp.ge.f32.partialorder %v359_v16, 0.0  ;;  %v399_v26 = vmul.f32 %v398_v10, %v359_v16  ;;  %vm394_vm5 = vcmp.ge.f32.partialorder %v375_v17, 0.0  ;;  %v403_v28 = vmul.f32 %v398_v10, %v375_v17 }
  0xeb   : > { %v409_v30 = vsel %vm392_vm2, %v367_v12, %v401_v20  ;;  %v413_v31 = vsel %vm396_vm3, %v383_v13, %v405_v22  ;;  %v370_v32 = vadd.f32 %v548_v18, %v518_v8  ;;  %v386_v33 = vadd.f32 %v552_v19, %v518_v8 }
  0xec   : > { %v425_v34 = vadd.f32 %v417_v21, %v409_v30  ;;  %v429_v35 = vadd.f32 %v421_v23, %v413_v31  ;;  %v407_v36 = vsel %vm390_vm4, %v359_v16, %v399_v26  ;;  %v411_v37 = vsel %vm394_vm5, %v375_v17, %v403_v28 }
  0xed   : > { %v423_v38 = vadd.f32 %v415_v27, %v407_v36  ;;  %v427_v39 = vadd.f32 %v419_v29, %v411_v37  ;;  %vm393_vm6 = vcmp.ge.f32.partialorder %v370_v32, 0.0  ;;  %v402_v40 = vmul.f32 %v398_v10, %v370_v32 }
  0xee   : > { %433 = vst [vmem:[%s656_s16 + $0x10] sm:$0xff] %v425_v34  ;;  %437 = vst [vmem:[%s656_s16 + $0x30] sm:$0xff] %v429_v35  ;;  %vm397_vm7 = vcmp.ge.f32.partialorder %v386_v33, 0.0  ;;  %v406_v42 = vmul.f32 %v398_v10, %v386_v33  ;;  %v362_v44 = vadd.f32 %v518_v8, %v361_v24  ;;  %v378_v45 = vadd.f32 %v518_v8, %v377_v25 }
  0xef   : > { %431 = vst [vmem:[%s656_s16] sm:$0xff] %v423_v38  ;;  %435 = vst [vmem:[%s656_s16 + $0x20] sm:$0xff] %v427_v39  ;;  %v410_v46 = vsel %vm393_vm6, %v370_v32, %v402_v40 }
  0xf0   : > { %v426_v47 = vadd.f32 %v418_v41, %v410_v46  ;;  %v414_v48 = vsel %vm397_vm7, %v386_v33, %v406_v42  ;;  %vm391_vm8 = vcmp.ge.f32.partialorder %v362_v44, 0.0  ;;  %v400_v49 = vmul.f32 %v398_v10, %v362_v44 }
  0xf1   : > { %v430_v51 = vadd.f32 %v422_v43, %v414_v48  ;;  %vm395_vm9 = vcmp.ge.f32.partialorder %v378_v45, 0.0  ;;  %v404_v52 = vmul.f32 %v398_v10, %v378_v45 }
  0xf2   : > { %434 = vst [vmem:[%s656_s16 + $0x18] sm:$0xff] %v426_v47  ;;  %v408_v54 = vsel %vm391_vm8, %v362_v44, %v400_v49 }
  0xf3   : > { %438 = vst [vmem:[%s656_s16 + $0x38] sm:$0xff] %v430_v51  ;;  %v424_v55 = vadd.f32 %v416_v50, %v408_v54  ;;  %v412_v56 = vsel %vm395_vm9, %v378_v45, %v404_v52 }
  0xf4   : > { %v428_v57 = vadd.f32 %v420_v53, %v412_v56 }
  0xf5   : > { %432 = vst [vmem:[%s656_s16 + $0x8] sm:$0xff] %v424_v55 }
  0xf6   : > { %436 = vst [vmem:[%s656_s16 + $0x28] sm:$0xff] %v428_v57 }
  0xf7 PF: > { %s16_s20 = sadd.s32 1, %s582_s20  }
  0xf8   : > { %p13_p4 = scmp.ge.s32.totalorder %s16_s20, 4  }
  0xfa   :  { %15 = sbr.rel (!%p13_p4) target bundleno = 2 (0x2), region = 73 }

</bundles_post_ra>
